<compile_context>
chip_gen: v7x
topology: tpu7x:2x2x1
jax: 0.10.0
libtpu: 0.0.40
codegen_flags: <defaults>
</compile_context>

<pallas_src>
import jax
import jax.numpy as jnp
from jax.experimental import pallas as pl
from jax.experimental.pallas import tpu as pltpu

VOCAB = 512        # stands in for len(vocab)
H1 = 128
H2 = 64
H2_PAD = 128       # lane-dense padded hidden-2 width
NUM_CLASSES = 3
OUT_PAD = 128      # lane-dense padded output width (>= NUM_CLASSES)
TM_MAX = 512       # max batch-tile rows (bf16 x tile = 512*512*2 B = 0.5 MiB)


def _round_up(x, m):
    return ((x + m - 1) // m) * m


def _pick_tile(b):
    """Batch tile: large aligned tile for big B, one sublane-aligned tile for small B."""
    if b >= TM_MAX:
        return TM_MAX
    return max(8, _round_up(b, 8))


def _mlp_kernel(x_ref, w1_ref, b1_ref, w2_ref, b2_ref, w3_ref, b3_ref, o_ref):
    # Layer 1: [TM, V](bf16) @ [V, 128](bf16) -> f32 acc, bias + ReLU in f32.
    h1 = jnp.dot(x_ref[...], w1_ref[...], preferred_element_type=jnp.float32)
    h1 = jnp.maximum(h1 + b1_ref[...], 0.0)
    # Layer 2: [TM, 128] @ [128, 128] (H2 zero-padded 64->128).
    h2 = jnp.dot(h1.astype(jnp.bfloat16), w2_ref[...],
                 preferred_element_type=jnp.float32)
    h2 = jnp.maximum(h2 + b2_ref[...], 0.0)
    # Layer 3: [TM, 128] @ [128, OUT_PAD] (cols >= NUM_CLASSES zero-padded).
    out = jnp.dot(h2.astype(jnp.bfloat16), w3_ref[...],
                  preferred_element_type=jnp.float32)
    o_ref[...] = (out + b3_ref[...]).astype(o_ref.dtype)


def prepare_params(params):
    """One-time conversion of raw [in,out] params into kernel-ready padded/bf16 form."""
    w1, b1, w2, b2, w3, b3 = params
    w2_p = jnp.zeros((H1, H2_PAD), jnp.float32).at[:, :H2].set(w2)
    b2_p = jnp.zeros((1, H2_PAD), jnp.float32).at[:, :H2].set(b2)
    w3_p = jnp.zeros((H2_PAD, OUT_PAD), jnp.float32).at[:H2, :NUM_CLASSES].set(w3)
    b3_p = jnp.zeros((1, OUT_PAD), jnp.float32).at[:, :NUM_CLASSES].set(b3)
    return (
        w1.astype(jnp.bfloat16),
        b1.reshape(1, -1).astype(jnp.float32),
        w2_p.astype(jnp.bfloat16),
        b2_p,
        w3_p.astype(jnp.bfloat16),
        b3_p,
    )


def text_classifier_forward(x, prepped):
    """x: [B, VOCAB] float32 -> logits [B, NUM_CLASSES] float32."""
    w1, b1, w2, b2, w3, b3 = prepped
    B = x.shape[0]

    tm = _pick_tile(B)
    Bp = _round_up(B, tm)
    if Bp != B:
        x = jnp.pad(x, ((0, Bp - B), (0, 0)))
    x = x.astype(jnp.bfloat16)

    grid = (Bp // tm,)
    const = lambda i: (0, 0)  # weights/biases: same block every step -> VMEM-resident

    out_padded = pl.pallas_call(
        _mlp_kernel,
        out_shape=jax.ShapeDtypeStruct((Bp, OUT_PAD), jnp.float32),
        grid=grid,
        in_specs=[
            pl.BlockSpec((tm, VOCAB), lambda i: (i, 0)),       # x tile (pipelined)
            pl.BlockSpec((VOCAB, H1), const),                  # w1
            pl.BlockSpec((1, H1), const),                      # b1
            pl.BlockSpec((H1, H2_PAD), const),                 # w2 (padded)
            pl.BlockSpec((1, H2_PAD), const),                  # b2 (padded)
            pl.BlockSpec((H2_PAD, OUT_PAD), const),            # w3 (padded)
            pl.BlockSpec((1, OUT_PAD), const),                 # b3 (padded)
        ],
        out_specs=pl.BlockSpec((tm, OUT_PAD), lambda i: (i, 0)),
        compiler_params=pltpu.CompilerParams(
            dimension_semantics=("parallel",),
        ),
    )(x, w1, b1, w2, b2, w3, b3)

    return out_padded[:B, :NUM_CLASSES]


def init_params(key):
    """Deterministic init mirroring nn.Linear shapes (stored transposed: [in, out])."""
    ks = jax.random.split(key, 6)

    def lin(kw, kb, fan_in, fan_out):
        bound = 1.0 / jnp.sqrt(fan_in)
        w = jax.random.uniform(kw, (fan_in, fan_out), jnp.float32, -bound, bound)
        b = jax.random.uniform(kb, (fan_out,), jnp.float32, -bound, bound)
        return w, b

    w1, b1 = lin(ks[0], ks[1], VOCAB, H1)
    w2, b2 = lin(ks[2], ks[3], H1, H2)
    w3, b3 = lin(ks[4], ks[5], H2, NUM_CLASSES)
    return (w1, b1, w2, b2, w3, b3)


if __name__ == "__main__":
    key = jax.random.PRNGKey(0)
    k_x, k_p = jax.random.split(key)

    B = 8
    # Bag-of-words style counts over the vocabulary (what this classifier consumes).
    x = jax.random.uniform(k_x, (B, VOCAB), jnp.float32)
    params = init_params(k_p)
    prepped = prepare_params(params)  # one-time padding / bf16 cast

    logits = jax.block_until_ready(text_classifier_forward(x, prepped))
    assert logits.shape == (B, NUM_CLASSES)

    # Pure-JAX reference mirroring the kernel's bf16-in / f32-accumulate path.
    w1, b1, w2, b2, w3, b3 = params
    f32 = jnp.float32
    bf = lambda a: a.astype(jnp.bfloat16).astype(f32)
    h1 = jnp.maximum(bf(x) @ bf(w1) + b1, 0.0)
    h2 = jnp.maximum(bf(h1) @ bf(w2) + b2, 0.0)
    ref = bf(h2) @ bf(w3) + b3
    assert jnp.allclose(logits, ref, atol=2e-2, rtol=2e-2), (
        float(jnp.max(jnp.abs(logits - ref)))
    )

    # TODO(synk): tokenizer / build_vocab_from_iterator (torchtext preprocessing)
    # has no Pallas equivalent; the kernel starts from the bag-of-words vectors.

    print("KERNEL_OK")
</pallas_src>

<mosaic_0001>
module attributes {stable_mosaic.version = 11 : i64} {
  func.func @_mlp_kernel(%arg0: i32, %arg1: memref<8x512xbf16, #tpu.memory_space<vmem>>, %arg2: memref<512x128xbf16, #tpu.memory_space<vmem>>, %arg3: memref<1x128xf32, #tpu.memory_space<vmem>>, %arg4: memref<128x128xbf16, #tpu.memory_space<vmem>>, %arg5: memref<1x128xf32, #tpu.memory_space<vmem>>, %arg6: memref<128x128xbf16, #tpu.memory_space<vmem>>, %arg7: memref<1x128xf32, #tpu.memory_space<vmem>>, %arg8: memref<8x128xf32, #tpu.memory_space<vmem>>) attributes {dimension_semantics = [#tpu.dimension_semantics<parallel>], iteration_bounds = array<i64: 1>, scalar_prefetch = 0 : i64, scratch_operands = 0 : i64, tpu.core_type = #tpu.core_type<tc>, window_params = [{transform_indices = @transform_0, window_bounds = array<i64: 8, 512>}, {pipeline_mode = #tpu.pipeline_mode<synchronous>, transform_indices = @transform_1, window_bounds = array<i64: 512, 128>}, {pipeline_mode = #tpu.pipeline_mode<synchronous>, transform_indices = @transform_2, window_bounds = array<i64: 1, 128>}, {pipeline_mode = #tpu.pipeline_mode<synchronous>, transform_indices = @transform_3, window_bounds = array<i64: 128, 128>}, {pipeline_mode = #tpu.pipeline_mode<synchronous>, transform_indices = @transform_4, window_bounds = array<i64: 1, 128>}, {pipeline_mode = #tpu.pipeline_mode<synchronous>, transform_indices = @transform_5, window_bounds = array<i64: 128, 128>}, {pipeline_mode = #tpu.pipeline_mode<synchronous>, transform_indices = @transform_6, window_bounds = array<i64: 1, 128>}, {transform_indices = @transform_7, window_bounds = array<i64: 8, 128>}]} {
    %c0 = arith.constant 0 : index
    %c0_0 = arith.constant 0 : index
    %0 = vector.load %arg1[%c0, %c0_0] : memref<8x512xbf16, #tpu.memory_space<vmem>>, vector<8x512xbf16>
    %c0_1 = arith.constant 0 : index
    %c0_2 = arith.constant 0 : index
    %1 = vector.load %arg2[%c0_1, %c0_2] : memref<512x128xbf16, #tpu.memory_space<vmem>>, vector<512x128xbf16>
    %cst = arith.constant dense<0.000000e+00> : vector<8x128xf32>
    %2 = tpu.matmul %0, %1, %cst {dimension_numbers = #tpu.dot_dimension_numbers<[1], [0], [0], [1], [0, 0, 1, 1], [], []>} : vector<8x512xbf16>, vector<512x128xbf16>, vector<8x128xf32> -> vector<8x128xf32>
    %c0_3 = arith.constant 0 : index
    %c0_4 = arith.constant 0 : index
    %3 = vector.load %arg3[%c0_3, %c0_4] : memref<1x128xf32, #tpu.memory_space<vmem>>, vector<1x128xf32>
    %4 = vector.broadcast %3 : vector<1x128xf32> to vector<8x128xf32>
    %5 = arith.addf %2, %4 : vector<8x128xf32>
    %cst_5 = arith.constant 0.000000e+00 : f32
    %6 = vector.broadcast %cst_5 : f32 to vector<8x128xf32>
    %7 = arith.maximumf %5, %6 : vector<8x128xf32>
    %8 = arith.truncf %7 : vector<8x128xf32> to vector<8x128xbf16>
    %c0_6 = arith.constant 0 : index
    %c0_7 = arith.constant 0 : index
    %9 = vector.load %arg4[%c0_6, %c0_7] : memref<128x128xbf16, #tpu.memory_space<vmem>>, vector<128x128xbf16>
    %cst_8 = arith.constant dense<0.000000e+00> : vector<8x128xf32>
    %10 = tpu.matmul %8, %9, %cst_8 {dimension_numbers = #tpu.dot_dimension_numbers<[1], [0], [0], [1], [0, 0, 1, 1], [], []>} : vector<8x128xbf16>, vector<128x128xbf16>, vector<8x128xf32> -> vector<8x128xf32>
    %c0_9 = arith.constant 0 : index
    %c0_10 = arith.constant 0 : index
    %11 = vector.load %arg5[%c0_9, %c0_10] : memref<1x128xf32, #tpu.memory_space<vmem>>, vector<1x128xf32>
    %12 = vector.broadcast %11 : vector<1x128xf32> to vector<8x128xf32>
    %13 = arith.addf %10, %12 : vector<8x128xf32>
    %cst_11 = arith.constant 0.000000e+00 : f32
    %14 = vector.broadcast %cst_11 : f32 to vector<8x128xf32>
    %15 = arith.maximumf %13, %14 : vector<8x128xf32>
    %16 = arith.truncf %15 : vector<8x128xf32> to vector<8x128xbf16>
    %c0_12 = arith.constant 0 : index
    %c0_13 = arith.constant 0 : index
    %17 = vector.load %arg6[%c0_12, %c0_13] : memref<128x128xbf16, #tpu.memory_space<vmem>>, vector<128x128xbf16>
    %cst_14 = arith.constant dense<0.000000e+00> : vector<8x128xf32>
    %18 = tpu.matmul %16, %17, %cst_14 {dimension_numbers = #tpu.dot_dimension_numbers<[1], [0], [0], [1], [0, 0, 1, 1], [], []>} : vector<8x128xbf16>, vector<128x128xbf16>, vector<8x128xf32> -> vector<8x128xf32>
    %c0_15 = arith.constant 0 : index
    %c0_16 = arith.constant 0 : index
    %19 = vector.load %arg7[%c0_15, %c0_16] : memref<1x128xf32, #tpu.memory_space<vmem>>, vector<1x128xf32>
    %20 = vector.broadcast %19 : vector<1x128xf32> to vector<8x128xf32>
    %21 = arith.addf %18, %20 : vector<8x128xf32>
    %c0_17 = arith.constant 0 : index
    %c0_18 = arith.constant 0 : index
    %22 = vector.load %arg8[%c0_17, %c0_18] : memref<8x128xf32, #tpu.memory_space<vmem>>, vector<8x128xf32>
    tpu.vector_store %arg8[%c0_17, %c0_18], %21 {strides = array<i32>} : memref<8x128xf32, #tpu.memory_space<vmem>>, vector<8x128xf32>,
    return
  }
  func.func @transform_0(%arg0: i32) -> (i32, i32) {
    %c0_i32 = arith.constant 0 : i32
    %c0_i32_0 = arith.constant 0 : i32
    return %arg0, %c0_i32 : i32, i32
  }
  func.func @transform_1(%arg0: i32) -> (i32, i32) {
    %c0_i32 = arith.constant 0 : i32
    %c0_i32_0 = arith.constant 0 : i32
    %c0_i32_1 = arith.constant 0 : i32
    return %c0_i32, %c0_i32_0 : i32, i32
  }
  func.func @transform_2(%arg0: i32) -> (i32, i32) {
    %c0_i32 = arith.constant 0 : i32
    %c0_i32_0 = arith.constant 0 : i32
    %c0_i32_1 = arith.constant 0 : i32
    return %c0_i32, %c0_i32_0 : i32, i32
  }
  func.func @transform_3(%arg0: i32) -> (i32, i32) {
    %c0_i32 = arith.constant 0 : i32
    %c0_i32_0 = arith.constant 0 : i32
    %c0_i32_1 = arith.constant 0 : i32
    return %c0_i32, %c0_i32_0 : i32, i32
  }
  func.func @transform_4(%arg0: i32) -> (i32, i32) {
    %c0_i32 = arith.constant 0 : i32
    %c0_i32_0 = arith.constant 0 : i32
    %c0_i32_1 = arith.constant 0 : i32
    return %c0_i32, %c0_i32_0 : i32, i32
  }
  func.func @transform_5(%arg0: i32) -> (i32, i32) {
    %c0_i32 = arith.constant 0 : i32
    %c0_i32_0 = arith.constant 0 : i32
    %c0_i32_1 = arith.constant 0 : i32
    return %c0_i32, %c0_i32_0 : i32, i32
  }
  func.func @transform_6(%arg0: i32) -> (i32, i32) {
    %c0_i32 = arith.constant 0 : i32
    %c0_i32_0 = arith.constant 0 : i32
    %c0_i32_1 = arith.constant 0 : i32
    return %c0_i32, %c0_i32_0 : i32, i32
  }
  func.func @transform_7(%arg0: i32) -> (i32, i32) {
    %c0_i32 = arith.constant 0 : i32
    %c0_i32_0 = arith.constant 0 : i32
    return %arg0, %c0_i32 : i32, i32
  }
}

</mosaic_0001>

<bundles_post_ra>
// kernel: tpu_custom_call.1
= control target key start
LH: loop header
LB: loop body
LE: loop exit
PB: predicated region body
PF: predicated region fallthrough
CT: control target
= control target key end

     0   :  { %12 = vsyncpa [#allocation3], 0  ;;  %s1165_s0 = inlined_call_operand.hbm [shape: bf16[8,512], index: 0, kind: input, shape index: {}]   ;;  %s1166_s1 = inlined_call_operand.hbm [shape: bf16[512,128], index: 1, kind: input, shape index: {}]   ;;  %s1167_s2 = inlined_call_operand.vmem [shape: f32[1,128], index: 2, kind: input, shape index: {}]   ;;  %s1168_s3 = inlined_call_operand.hbm [shape: bf16[128,128], index: 3, kind: input, shape index: {}]   ;;  %s1169_s4 = inlined_call_operand.vmem [shape: f32[1,128], index: 4, kind: input, shape index: {}]   ;;  %s1170_s5 = inlined_call_operand.hbm [shape: bf16[128,128], index: 5, kind: input, shape index: {}]   ;;  %s1171_s6 = inlined_call_operand.vmem [shape: f32[1,128], index: 6, kind: input, shape index: {}]   ;;  %s1172_s7 = inlined_call_operand.hbm [shape: f32[8,128], index: 7, kind: output, shape index: {}]  }
   0x1   :  { %13 = vsyncpa [#allocation6], 0 }
   0x2   :  { %14 = vsyncpa [#allocation9], 0 }
   0x3   :  { %15 = vsyncpa [#allocation4], 0  ;;  %s1020_s24 = smov [#allocation5]   ;;  %s902_s28 = scalar_lea.hbm %s1166_s1, 4096 }
   0x4   :  { %s31_s25 = sshll.u32 %s1020_s24, 4  ;;  %p903_p0 = scmp.ne.s32.totalorder %s1166_s1, %s902_s28  ;;  %s32_s25 = int_to_ptr.vmem [resolvable:$true] %s31_s25 }
   0x5   :  { %p906_p1 = scmp.lt.u32.totalorder %s902_s28, %s1166_s1 }
   0x7   :  { %p908_p2 = pnand %p906_p1, %p903_p0 }
   0x9   :  { %911 = shalt.err (!%p908_p2)
}
   0xa   :  { %s912_s10 = scalar_lea.vmem %s32_s25, 4096  ;;  %p917_p4 = scmp.lt.s32.totalorder %s32_s25, %s32_s25 }
   0xb   :  { %p913_p3 = scmp.ne.s32.totalorder %s32_s25, %s912_s10  ;;  %p918_p5 = scmp.lt.s32.totalorder %s912_s10, %s912_s10 }
   0xd   :  { %p919_p6 = por %p918_p5, %p917_p4 }
   0xf   :  { %p920_p7 = pnand %p919_p6, %p913_p3 }
  0x11   :  { %923 = shalt.err (!%p920_p7)
}
  0x12   :  { %s1021_s11 = smov 64   ;;  %s1022_s12 = smov 4  }
  0x13   :  { %37 = dma.hbm_to_vmem [thread:$0]  %s1166_s1, 4096, %s32_s25, [#allocation6], %s1021_s11, %s1021_s11, %s1022_s12  }
  0x14   :  { %s1023_s15 = smov [#allocation2]   ;;  %s1024_s17 = smov [#allocation7]  }
  0x15   :  { %s22_s16 = sshll.u32 %s1023_s15, 4  ;;  %s45_s18 = sshll.u32 %s1024_s17, 4  ;;  %s23_s16 = int_to_ptr.vmem [resolvable:$true] %s22_s16  ;;  %s46_s18 = int_to_ptr.vmem [resolvable:$true] %s45_s18 }
  0x16   :  { %s924_s21 = scalar_lea.hbm %s1165_s0, 256 }
  0x17   :  { %p925_p8 = scmp.ne.s32.totalorder %s1165_s0, %s924_s21  ;;  %p928_p9 = scmp.lt.u32.totalorder %s924_s21, %s1165_s0 }
  0x19   :  { %p930_p10 = pnand %p928_p9, %p925_p8 }
  0x1b   :  { %933 = shalt.err (!%p930_p10)
}
  0x1c   :  { %s934_s1 = scalar_lea.vmem %s23_s16, 256  ;;  %p939_p12 = scmp.lt.s32.totalorder %s23_s16, %s23_s16 }
  0x1d   :  { %p935_p11 = scmp.ne.s32.totalorder %s23_s16, %s934_s1  ;;  %p940_p13 = scmp.lt.s32.totalorder %s934_s1, %s934_s1 }
  0x1f   :  { %p941_p0 = por %p940_p13, %p939_p12 }
  0x21   :  { %p942_p1 = pnand %p941_p0, %p935_p11 }
  0x23   :  { %945 = shalt.err (!%p942_p1)
}
  0x24   :  { %25 = dma.hbm_to_vmem [thread:$0]  %s1165_s0, 256, %s23_s16, [#allocation3]  }
  0x25   :  { %s946_s30 = scalar_lea.hbm %s1168_s3, 1024 }
  0x26   :  { %p947_p2 = scmp.ne.s32.totalorder %s1168_s3, %s946_s30  ;;  %p950_p3 = scmp.lt.u32.totalorder %s946_s30, %s1168_s3 }
  0x28   :  { %p952_p4 = pnand %p950_p3, %p947_p2 }
  0x2a   :  { %955 = shalt.err (!%p952_p4)
}
  0x2b   :  { %s956_s14 = scalar_lea.vmem %s46_s18, 1024  ;;  %p961_p6 = scmp.lt.s32.totalorder %s46_s18, %s46_s18 }
  0x2c   :  { %p957_p5 = scmp.ne.s32.totalorder %s46_s18, %s956_s14  ;;  %p962_p7 = scmp.lt.s32.totalorder %s956_s14, %s956_s14 }
  0x2e   :  { %p963_p8 = por %p962_p7, %p961_p6 }
  0x30   :  { %p964_p9 = pnand %p963_p8, %p957_p5 }
  0x32   :  { %967 = shalt.err (!%p964_p9)
}
  0x33   :  { %51 = dma.hbm_to_vmem [thread:$0]  %s1168_s3, 1024, %s46_s18, [#allocation6], %s1021_s11, %s1021_s11, %s1022_s12  }
  0x34   :  { %s1025_s16 = smov [#allocation8]   ;;  %s968_s21 = scalar_lea.hbm %s1170_s5, 1024 }
  0x35   :  { %s59_s17 = sshll.u32 %s1025_s16, 4  ;;  %p969_p10 = scmp.ne.s32.totalorder %s1170_s5, %s968_s21  ;;  %s60_s17 = int_to_ptr.vmem [resolvable:$true] %s59_s17 }
  0x36   :  { %p972_p11 = scmp.lt.u32.totalorder %s968_s21, %s1170_s5 }
  0x38   :  { %p974_p12 = pnand %p972_p11, %p969_p10 }
  0x3a   :  { %977 = shalt.err (!%p974_p12)
}
  0x3b   :  { %s978_s1 = scalar_lea.vmem %s60_s17, 1024  ;;  %p983_p0 = scmp.lt.s32.totalorder %s60_s17, %s60_s17 }
  0x3c   :  { %p979_p13 = scmp.ne.s32.totalorder %s60_s17, %s978_s1  ;;  %p984_p1 = scmp.lt.s32.totalorder %s978_s1, %s978_s1 }
  0x3e   :  { %p985_p2 = por %p984_p1, %p983_p0 }
  0x40   :  { %p986_p3 = pnand %p985_p2, %p979_p13 }
  0x42   :  { %989 = shalt.err (!%p986_p3)
}
  0x43   :  { %65 = dma.hbm_to_vmem [thread:$0]  %s1170_s5, 1024, %s60_s17, [#allocation9], %s1021_s11, %s1021_s11, %s1022_s12  }
  0x44   :  { %1012 = dma.done.wait [#allocation3], 256  }
  0x45   :  { %1013 = vsyncadd [#allocation3], 4294967040 }
  0x46   :  { %1014 = dma.done.wait [#allocation6], 5120  }
  0x47   :  { %1015 = vsyncadd [#allocation6], 4294962176 }
  0x48   :  { %1016 = dma.done.wait [#allocation9], 1024  }
  0x49   :  { %1017 = vsyncadd [#allocation9], 4294966272  ;;  %v850_v0 = vld [vmem:[#allocation5 + $0x40] sm:$0xff]   ;;  %v854_v4 = vld [vmem:[#allocation5 + $0x48] sm:$0xff]   ;;  %v1026_v39 = vmov 0.0   ;;  %vm1027_vm0 = vmmov 0  }
  0x4a   :  { %v851_v1 = vld [vmem:[#allocation5 + $0xc0] sm:$0xff]   ;;  %739 = vmatprep.subr.bf16.mxu0 %v850_v0  ;;  %v855_v5 = vld [vmem:[#allocation5 + $0xc8] sm:$0xff]   ;;  %v858_v8 = vld [vmem:[#allocation5 + $0x50] sm:$0xff]   ;;  %s1028_s28 = smov [#allocation10]  }
  0x4b   :  { %v852_v2 = vld [vmem:[#allocation5] sm:$0xff]   ;;  %761 = vmatprep.subr.bf16.mxu1 %v851_v1  ;;  %v856_v6 = vld [vmem:[#allocation5 + $0x8] sm:$0xff]   ;;  %v859_v9 = vld [vmem:[#allocation5 + $0xd0] sm:$0xff]   ;;  %s673_s29 = sshll.u32 %s1028_s28, 4  ;;  %s674_s29 = int_to_ptr.vmem [resolvable:$true] %s673_s29 }
  0x4c   :  { %v853_v3 = vld [vmem:[#allocation5 + $0x80] sm:$0xff]   ;;  %740 = vmatpush3.bf16.msra.mxu0 %v852_v2  ;;  %v857_v7 = vld [vmem:[#allocation5 + $0x88] sm:$0xff]   ;;  %v860_v10 = vld [vmem:[#allocation5 + $0x10] sm:$0xff]   ;;  %p995_p5 = scmp.lt.s32.totalorder %s674_s29, %s674_s29 }
  0x4d   :  { %762 = vmatpush3.bf16.msra.mxu1 %v853_v3  ;;  %741 = vmatprep.subr.bf16.mxu0 %v854_v4  ;;  %v861_v11 = vld [vmem:[#allocation5 + $0x90] sm:$0xff]   ;;  %v862_v12 = vld [vmem:[#allocation5 + $0x58] sm:$0xff]   ;;  %v866_v16 = vld [vmem:[#allocation5 + $0x60] sm:$0xff]  }
  0x4e   :  { %763 = vmatprep.subr.bf16.mxu1 %v855_v5  ;;  %v863_v13 = vld [vmem:[#allocation5 + $0xd8] sm:$0xff]   ;;  %v867_v17 = vld [vmem:[#allocation5 + $0xe0] sm:$0xff]   ;;  %v870_v20 = vld [vmem:[#allocation5 + $0x68] sm:$0xff]  }
  0x4f   :  { %v864_v14 = vld [vmem:[#allocation5 + $0x18] sm:$0xff]   ;;  %v868_v18 = vld [vmem:[#allocation5 + $0x20] sm:$0xff]   ;;  %v871_v21 = vld [vmem:[#allocation5 + $0xe8] sm:$0xff]  }
  0x50   :  { %742 = vmatpush3.bf16.msra.mxu0 %v856_v6  ;;  %v865_v15 = vld [vmem:[#allocation5 + $0x98] sm:$0xff]   ;;  %v869_v19 = vld [vmem:[#allocation5 + $0xa0] sm:$0xff]   ;;  %v872_v22 = vld [vmem:[#allocation5 + $0x28] sm:$0xff]  }
  0x51   :  { %764 = vmatpush3.bf16.msra.mxu1 %v857_v7  ;;  %743 = vmatprep.subr.bf16.mxu0 %v858_v8  ;;  %v873_v23 = vld [vmem:[#allocation5 + $0xa8] sm:$0xff]   ;;  %v874_v24 = vld [vmem:[#allocation5 + $0x70] sm:$0xff]   ;;  %v878_v28 = vld [vmem:[#allocation5 + $0x78] sm:$0xff]  }
  0x52   :  { %765 = vmatprep.subr.bf16.mxu1 %v859_v9  ;;  %v875_v25 = vld [vmem:[#allocation5 + $0xf0] sm:$0xff]   ;;  %v879_v29 = vld [vmem:[#allocation5 + $0xf8] sm:$0xff]   ;;  %v886_v38 = vld [vmem:[#allocation7] sm:$0xff]  }
  0x53   :  { %v876_v26 = vld [vmem:[#allocation5 + $0x30] sm:$0xff]   ;;  %v880_v30 = vld [vmem:[#allocation5 + $0x38] sm:$0xff]   ;;  %v887_v40 = vld [vmem:[#allocation7 + $0x8] sm:$0xff]  }
  0x54   :  { %744 = vmatpush3.bf16.msra.mxu0 %v860_v10  ;;  %v877_v27 = vld [vmem:[#allocation5 + $0xb0] sm:$0xff]   ;;  %v881_v31 = vld [vmem:[#allocation5 + $0xb8] sm:$0xff]   ;;  %v890_v43 = vld [vmem:[#allocation7 + $0x20] sm:$0xff]  }
  0x55   :  { %766 = vmatpush3.bf16.msra.mxu1 %v861_v11  ;;  %745 = vmatprep.subr.bf16.mxu0 %v862_v12  ;;  %v81_v32 = vld [vmem:[#allocation2] sm:$0xff]  ;;  %v82_v33 = vld [vmem:[#allocation2 + $0x8] sm:$0xff]  ;;  %v891_v44 = vld [vmem:[#allocation7 + $0x28] sm:$0xff]  }
  0x56   :  { %767 = vmatprep.subr.bf16.mxu1 %v863_v13  ;;  %v685_v34 = vcombine.low %v81_v32, %v81_v32  ;;  %v686_v35 = vcombine.high %v81_v32, %v81_v32  ;;  %v687_v36 = vcombine.low %v82_v33, %v82_v33  ;;  %v688_v37 = vcombine.high %v82_v33, %v82_v33  ;;  %v888_v41 = vld [vmem:[#allocation7 + $0x10] sm:$0xff]   ;;  %v889_v42 = vld [vmem:[#allocation7 + $0x18] sm:$0xff]   ;;  %v894_v47 = vld [vmem:[#allocation8] sm:$0xff]  }
  0x57   :  { %v892_v45 = vld [vmem:[#allocation7 + $0x30] sm:$0xff]   ;;  %v893_v46 = vld [vmem:[#allocation7 + $0x38] sm:$0xff]   ;;  %v895_v48 = vld [vmem:[#allocation8 + $0x8] sm:$0xff]  }
  0x58   :  { %746 = vmatpush3.bf16.msra.mxu0 %v864_v14  ;;  %392 = vmatprep.mubr.bf16.mxu0 %v686_v35  ;;  %v896_v49 = vld [vmem:[#allocation8 + $0x10] sm:$0xff]   ;;  %v897_v50 = vld [vmem:[#allocation8 + $0x18] sm:$0xff]   ;;  %v898_v51 = vld [vmem:[#allocation8 + $0x20] sm:$0xff]  }
  0x59   :  { %768 = vmatpush3.bf16.msra.mxu1 %v865_v15  ;;  %747 = vmatprep.subr.bf16.mxu0 %v866_v16  ;;  %v899_v52 = vld [vmem:[#allocation8 + $0x28] sm:$0xff]   ;;  %v684_v55 = vld [vmem:[%s1167_s2] ss:$0 sm:$0xff]  ;;  %v901_v5 = vld [vmem:[#allocation8 + $0x38] sm:$0xff]  }
  0x5a   :  { %769 = vmatprep.subr.bf16.mxu1 %v867_v17  ;;  %432 = vmatprep.mubr.bf16.mxu1 %v688_v37  ;;  %v900_v4 = vld [vmem:[#allocation8 + $0x30] sm:$0xff]  }
  0x5b   :  { %v721_v6 = vld [vmem:[%s1169_s4] ss:$0 sm:$0xff]  ;;  %s990_s4 = scalar_lea.vmem %s674_s29, 128 }
  0x5c   :  { %748 = vmatpush3.bf16.msra.mxu0 %v868_v18  ;;  %v730_v14 = vld [vmem:[%s1171_s6] ss:$0 sm:$0xff]  ;;  %p991_p4 = scmp.ne.s32.totalorder %s674_s29, %s990_s4  ;;  %p996_p6 = scmp.lt.s32.totalorder %s990_s4, %s990_s4 }
  0x5d   :  { %770 = vmatpush3.bf16.msra.mxu1 %v869_v19  ;;  %749 = vmatprep.subr.bf16.mxu0 %v870_v20 }
  0x5e   :  { %771 = vmatprep.subr.bf16.mxu1 %v871_v21  ;;  %p997_p7 = por %p996_p6, %p995_p5 }
  0x60   :  { %750 = vmatpush3.bf16.msra.mxu0 %v872_v22  ;;  %p998_p8 = pnand %p997_p7, %p991_p4 }
  0x61   :  { %772 = vmatpush3.bf16.msra.mxu1 %v873_v23  ;;  %751 = vmatprep.subr.bf16.mxu0 %v874_v24 }
  0x62   :  { %773 = vmatprep.subr.bf16.mxu1 %v875_v25 }
  0x64   :  { %752 = vmatpush3.bf16.msra.mxu0 %v876_v26 }
  0x65   :  { %774 = vmatpush3.bf16.msra.mxu1 %v877_v27  ;;  %753 = vmatprep.subr.bf16.mxu0 %v878_v28 }
  0x66   :  { %775 = vmatprep.subr.bf16.mxu1 %v879_v29 }
  0x68   :  { %754 = vmatpush3.bf16.msra.mxu0 %v880_v30 }
  0x69   :  { %776 = vmatpush3.bf16.msra.mxu1 %v881_v31  ;;  %801 = vmatprep.subr.bf16.mxu0 %v1026_v39 }
  0x6a   :  { %821 = vmatprep.subr.bf16.mxu1 %v1026_v39 }
  0x6b   :  { %393 = vmatmul.mubr.bf16.vlgmr.msra.gmra.mrb[0].mxu0 %v685_v34 }
  0x6c   :  { %433 = vmatmul.mubr.bf16.vlgmr.msra.gmra.mrb[0].mxu1 %v687_v36  ;;  %802 = vmatpush3.bf16.msra.mxu0 %v886_v38 }
  0x6d   :  { %803 = vmatprep.subr.bf16.mxu0 %v1026_v39  ;;  %817 = vmatprep.mubr.msk.bf16.mxu0 %vm1027_vm0, %v1026_v39 }
  0x6e   :  { %837 = vmatprep.mubr.msk.bf16.mxu1 %vm1027_vm0, %v1026_v39  ;;  %822 = vmatpush3.bf16.msra.mxu1 %v894_v47 }
  0x6f   :  { %823 = vmatprep.subr.bf16.mxu1 %v1026_v39 }
  0x70   :  { %804 = vmatpush3.bf16.msra.mxu0 %v887_v40 }
  0x71   :  { %805 = vmatprep.subr.bf16.mxu0 %v1026_v39 }
  0x72   :  { %824 = vmatpush3.bf16.msra.mxu1 %v895_v48 }
  0x73   :  { %825 = vmatprep.subr.bf16.mxu1 %v1026_v39 }
  0x74   :  { %806 = vmatpush3.bf16.msra.mxu0 %v888_v41 }
  0x75   :  { %807 = vmatprep.subr.bf16.mxu0 %v1026_v39 }
  0x76   :  { %826 = vmatpush3.bf16.msra.mxu1 %v896_v49 }
  0x77   :  { %827 = vmatprep.subr.bf16.mxu1 %v1026_v39 }
  0x78   :  { %808 = vmatpush3.bf16.msra.mxu0 %v889_v42 }
  0x79   :  { %809 = vmatprep.subr.bf16.mxu0 %v1026_v39 }
  0x7a   :  { %828 = vmatpush3.bf16.msra.mxu1 %v897_v50 }
  0x7b   :  { %829 = vmatprep.subr.bf16.mxu1 %v1026_v39 }
  0x7c   :  { %810 = vmatpush3.bf16.msra.mxu0 %v890_v43 }
  0x7d   :  { %811 = vmatprep.subr.bf16.mxu0 %v1026_v39 }
  0x7e   :  { %830 = vmatpush3.bf16.msra.mxu1 %v898_v51 }
  0x7f   :  { %831 = vmatprep.subr.bf16.mxu1 %v1026_v39 }
  0x80   :  { %812 = vmatpush3.bf16.msra.mxu0 %v891_v44 }
  0x81   :  { %813 = vmatprep.subr.bf16.mxu0 %v1026_v39 }
  0x82   :  { %832 = vmatpush3.bf16.msra.mxu1 %v899_v52 }
  0x83   :  { %833 = vmatprep.subr.bf16.mxu1 %v1026_v39 }
  0x84   :  { %814 = vmatpush3.bf16.msra.mxu0 %v892_v45 }
  0x85   :  { %815 = vmatprep.subr.bf16.mxu0 %v1026_v39 }
  0x86   :  { %834 = vmatpush3.bf16.msra.mxu1 %v900_v4 }
  0x87   :  { %835 = vmatprep.subr.bf16.mxu1 %v1026_v39 }
  0x88   :  { %816 = vmatpush3.bf16.msra.mxu0 %v893_v46 }
  0x8a   :  { %836 = vmatpush3.bf16.msra.mxu1 %v901_v5 }
 0x13e   :  { %v755_v53 = vpop.f32.mrb[0].mxu0 }
 0x13f   :  { %v777_v54 = vpop.f32.mrb[0].mxu1  ;;  %v756_v56 = vpop.f32.mrb[1].mxu0 }
 0x140   :  { %v778_v57 = vpop.f32.mrb[1].mxu1  ;;  %v757_v58 = vadd.f32 %v756_v56, %v755_v53  ;;  %v758_v60 = vpop.f32.mrb[2].mxu0 }
 0x141   :  { %v779_v59 = vadd.f32 %v778_v57, %v777_v54  ;;  %v780_v61 = vpop.f32.mrb[2].mxu1  ;;  %v759_v62 = vpop.f32.mrb[3].mxu0 }
 0x142   :  { %v781_v63 = vpop.f32.mrb[3].mxu1  ;;  %v395_v0 = vadd.f32 %v757_v58, %v684_v55 }
 0x144   :  { %v435_v1 = vadd.f32 %v779_v59, %v395_v0 }
 0x146   :  { %v440_v2 = vmax.f32 %v435_v1, 0.0 }
 0x148   :  { %v441_v3 = vpack.c.bf16 %v440_v2, %v440_v2 }
 0x14a   :  { %818 = vmatmul.mubr.bf16.vlgmr.msra.gmra.mrb[4].mxu0 %v441_v3 }
 0x21d   :  { %v547_v7 = vpop.f32.mrb[4].mxu0 }
 0x21e   :  { %v548_v8 = vadd.f32 %v721_v6, %v547_v7  ;;  %v819_v9 = vpop.f32.mrb[5].mxu0 }
 0x21f   :  { %v550_v10 = vpop.f32.mrb[6].mxu0 }
 0x220   :  { %v553_v11 = vmax.f32 %v548_v8, 0.0  ;;  %v820_v12 = vpop.f32.mrb[7].mxu0 }
 0x222   :  { %v554_v13 = vpack.c.bf16 %v553_v11, %v553_v11 }
 0x224   :  { %838 = vmatmul.mubr.bf16.vlgmr.msra.gmra.mrb[4].mxu1 %v554_v13 }
 0x2f7   :  { %v660_v15 = vpop.f32.mrb[4].mxu1 }
 0x2f8   :  { %v661_v16 = vadd.f32 %v730_v14, %v660_v15  ;;  %v839_v17 = vpop.f32.mrb[5].mxu1 }
 0x2f9   :  { %v663_v18 = vpop.f32.mrb[6].mxu1 }
 0x2fa   :  { %666 = vst [vmem:[#allocation10] sm:$0xff] %v661_v16  ;;  %v840_v19 = vpop.f32.mrb[7].mxu1 }
 0x2fb   :  { %1001 = shalt.err (!%p998_p8)
}
 0x2fc   :  { %s1002_s6 = scalar_lea.hbm %s1172_s7, 128 }
 0x2fd   :  { %p1003_p9 = scmp.ne.s32.totalorder %s1172_s7, %s1002_s6  ;;  %p1006_p10 = scmp.lt.u32.totalorder %s1002_s6, %s1172_s7 }
 0x2ff   :  { %p1008_p11 = pnand %p1006_p10, %p1003_p9 }
 0x301   :  { %1011 = shalt.err (!%p1008_p11)
}
 0x302   :  { %676 = dma.vmem_to_hbm [thread:$0]  %s674_s29, 128, %s1172_s7, [#allocation4]  }
 0x303   :  { %1018 = dma.done.wait [#allocation4], 128  }
 0x304   :  { %1019 = vsyncadd [#allocation4], 4294967168 }
 0x305   :  { %680 = vsyncpa [#allocation3], 1 }
 0x306   :  { %681 = vsyncpa [#allocation6], 1 }
 0x307   :  { %682 = vsyncpa [#allocation9], 1 }
 0x308   :  { %683 = vsyncpa [#allocation4], 1 }

</bundles_post_ra>
